<compile_context>
chip_gen: v5e
topology: v5e:2x2
jax: 0.10.0
libtpu: 0.0.40
codegen_flags: <defaults>
</compile_context>

<pallas_src>
import functools

import jax
import jax.numpy as jnp
from jax.experimental import pallas as pl
from jax.experimental.pallas import tpu as pltpu


def _label_smooth_ce_kernel(logits_ref, targets_ref, out_ref, *,
                            ignore_index: int, n_rows: int, block_rows: int):
    pid = pl.program_id(0)

    x = logits_ref[...]                                          # (TN, C), input dtype
    tn, c = x.shape

    # Global row index -> mask rows padded past N in the last (partial) tile.
    row_idx = pid * block_rows + jax.lax.broadcasted_iota(jnp.int32, (tn, 1), 0)
    row_valid = row_idx < n_rows                                  # (TN, 1)

    # Single shifted f32 stream xs = x - m; everything downstream uses xs.
    #   lse         = m + log(sum exp xs)
    #   -sum_c logp = C*lse - sum_c x  = C*log(sum exp xs) - sum_c xs      (m cancels)
    #   -logp[i,t]  = lse - x[i,t]     = log(sum exp xs) - xs[i,t]
    m = jnp.max(x, axis=-1, keepdims=True).astype(jnp.float32)    # (TN, 1)
    xs = x.astype(jnp.float32) - m                                # (TN, C)

    sum_xs = jnp.sum(xs, axis=-1, keepdims=True)                  # (TN, 1)
    lse_s = jnp.log(jnp.sum(jnp.exp(xs), axis=-1, keepdims=True))  # (TN, 1)

    tgt = targets_ref[...]                                        # (TN, 1) int32
    col = jax.lax.broadcasted_iota(jnp.int32, (tn, c), 1)
    picked_s = jnp.sum(jnp.where(col == tgt, xs, 0.0),
                       axis=-1, keepdims=True)                    # (TN, 1) = x[i,t] - m

    smooth_row = jnp.where(row_valid, c * lse_s - sum_xs, 0.0)
    tgt_valid = jnp.logical_and(row_valid, tgt != ignore_index)
    nll_row = jnp.where(tgt_valid, lse_s - picked_s, 0.0)

    smooth_p = jnp.sum(smooth_row)
    nll_p = jnp.sum(nll_row)
    nvalid_p = jnp.sum(tgt_valid.astype(jnp.float32))

    # Pack the three per-tile partials into a lane-dense (1, 8, 128) output block:
    # sublane 0 -> smooth, 1 -> nll, 2 -> n_valid (each broadcast across 128 lanes).
    sub = jax.lax.broadcasted_iota(jnp.int32, out_ref.shape, 1)
    out_ref[...] = (jnp.where(sub == 0, smooth_p, 0.0)
                    + jnp.where(sub == 1, nll_p, 0.0)
                    + jnp.where(sub == 2, nvalid_p, 0.0)).astype(jnp.float32)


def _choose_block_rows(n, c, itemsize, *,
                       target_block_bytes=8 << 20, max_block_bytes=12 << 20):
    """~8 MiB logits blocks (2x-buffered), capped at 12 MiB; sublane-aligned rows."""
    align = 16 if itemsize < 4 else 8                # bf16 sublane packing
    row_bytes = max(1, c * itemsize)
    tn = (target_block_bytes // row_bytes) // align * align
    tn = max(align, tn)
    # Wide-C guard: keep the double-buffered block inside the VMEM budget.
    while tn > align and tn * row_bytes > max_block_bytes:
        tn -= align
    tn = min(tn, 4096)
    if tn >= n:
        return int(n)                                # single block (block dim == full dim)
    return int(tn)


def label_smooth_cross_entropy(logits, targets, *, eps=0.1,
                               reduction='mean', ignore_index=-100,
                               block_rows=None):
    """logits: (N, C) float; targets: (N,) int. Returns scalar f32 loss."""
    if reduction not in ('mean', 'sum'):
        raise ValueError(f"unsupported reduction for this kernel: {reduction!r}")

    n, c = logits.shape
    itemsize = jnp.dtype(logits.dtype).itemsize
    if block_rows is None:
        block_rows = _choose_block_rows(n, c, itemsize)
    num_tiles = int(pl.cdiv(n, block_rows))

    targets2d = targets.astype(jnp.int32).reshape(n, 1)

    kernel = functools.partial(
        _label_smooth_ce_kernel,
        ignore_index=int(ignore_index), n_rows=int(n), block_rows=int(block_rows))

    block_bytes = int(block_rows) * int(c) * int(itemsize)
    vmem_limit = int(min(48 << 20, max(32 << 20, 2 * block_bytes + (6 << 20))))

    cost = pl.CostEstimate(
        flops=5 * n * c,
        transcendentals=n * c + n,
        bytes_accessed=n * c * itemsize + n * 4 + num_tiles * 8 * 128 * 4)

    partials = pl.pallas_call(
        kernel,
        out_shape=jax.ShapeDtypeStruct((num_tiles, 8, 128), jnp.float32),
        grid=(num_tiles,),
        in_specs=[
            pl.BlockSpec((block_rows, c), lambda i: (i, 0)),
            pl.BlockSpec((block_rows, 1), lambda i: (i, 0)),
        ],
        out_specs=pl.BlockSpec((1, 8, 128), lambda i: (i, 0, 0)),
        compiler_params=pltpu.CompilerParams(
            dimension_semantics=("parallel",),
            vmem_limit_bytes=vmem_limit),
        cost_estimate=cost,
    )(logits, targets2d)

    # Tiny final reduction + loss formula in plain JAX (kept outside the kernel so the
    # grid axis stays fully parallel and the per-tile partials are summed in one place).
    smooth_sum = jnp.sum(partials[:, 0, 0])
    nll_sum = jnp.sum(partials[:, 1, 0])
    n_valid = jnp.maximum(jnp.sum(partials[:, 2, 0]), 1.0)   # guard all-ignored batch

    if reduction == 'mean':
        smooth = smooth_sum / float(n)
        nll = nll_sum / n_valid
    else:  # 'sum'
        smooth = smooth_sum
        nll = nll_sum
    return smooth * (eps / c) + (1.0 - eps) * nll


def _reference(logits, targets, *, eps=0.1, ignore_index=-100, reduction='mean'):
    x = logits.astype(jnp.float32)
    logp = jax.nn.log_softmax(x, axis=-1)
    n, c = x.shape
    valid = targets != ignore_index
    picked = jnp.take_along_axis(
        logp, targets.reshape(n, 1).astype(jnp.int32), axis=-1)[:, 0]
    nll_terms = jnp.where(valid, -picked, 0.0)
    if reduction == 'sum':
        smooth = -jnp.sum(logp)
        nll = jnp.sum(nll_terms)
    else:
        smooth = jnp.mean(-jnp.sum(logp, axis=-1))
        nll = jnp.sum(nll_terms) / jnp.maximum(jnp.sum(valid.astype(jnp.float32)), 1.0)
    return smooth * eps / c + (1.0 - eps) * nll


if __name__ == "__main__":
    key = jax.random.PRNGKey(0)
    k1, k2, k3, k4 = jax.random.split(key, 4)

    # Test 1: small batch, one ignored row, reduction='mean' (single tile).
    N, C = 8, 32
    logits = jax.random.normal(k1, (N, C), dtype=jnp.float32)
    targets = jax.random.randint(k2, (N,), 0, C, dtype=jnp.int32)
    targets = targets.at[3].set(-100)

    loss = label_smooth_cross_entropy(logits, targets, eps=0.1,
                                      reduction='mean', ignore_index=-100)
    loss = jax.block_until_ready(loss)
    ref = _reference(logits, targets, eps=0.1, ignore_index=-100, reduction='mean')
    assert jnp.allclose(loss, ref, rtol=1e-5, atol=1e-5), (loss, ref)

    # Test 2: N not a multiple of the row tile -> exercises padded-row masking across a
    # multi-tile parallel grid with per-tile partial outputs.
    N2, C2 = 20, 256
    logits2 = jax.random.normal(k3, (N2, C2), dtype=jnp.float32)
    targets2 = jax.random.randint(k4, (N2,), 0, C2, dtype=jnp.int32)
    targets2 = targets2.at[0].set(-100)

    loss2 = label_smooth_cross_entropy(logits2, targets2, eps=0.1,
                                       reduction='mean', ignore_index=-100,
                                       block_rows=8)
    loss2 = jax.block_until_ready(loss2)
    ref2 = _reference(logits2, targets2, eps=0.1, ignore_index=-100, reduction='mean')
    assert jnp.allclose(loss2, ref2, rtol=1e-5, atol=1e-5), (loss2, ref2)

    # Test 3: reduction='sum'.
    loss3 = label_smooth_cross_entropy(logits, targets, eps=0.1,
                                       reduction='sum', ignore_index=-100)
    loss3 = jax.block_until_ready(loss3)
    ref3 = _reference(logits, targets, eps=0.1, ignore_index=-100, reduction='sum')
    assert jnp.allclose(loss3, ref3, rtol=1e-5, atol=1e-5), (loss3, ref3)

    # Test 4: bf16 logits streamed as-is (halved HBM bytes), f32 math in-kernel.
    logits_bf16 = logits2.astype(jnp.bfloat16)
    loss4 = label_smooth_cross_entropy(logits_bf16, targets2, eps=0.1,
                                       reduction='mean', ignore_index=-100,
                                       block_rows=16)
    loss4 = jax.block_until_ready(loss4)
    ref4 = _reference(logits_bf16, targets2, eps=0.1, ignore_index=-100, reduction='mean')
    assert jnp.allclose(loss4, ref4, rtol=2e-2, atol=2e-2), (loss4, ref4)

    print("KERNEL_OK")
</pallas_src>

<mosaic_0001>
module attributes {stable_mosaic.version = 11 : i64} {
  func.func @_label_smooth_ce_kernel(%arg0: i32, %arg1: memref<8x32xf32, #tpu.memory_space<vmem>>, %arg2: memref<8x1xi32, #tpu.memory_space<vmem>>, %arg3: memref<1x8x128xf32, #tpu.memory_space<vmem>>) attributes {dimension_semantics = [#tpu.dimension_semantics<parallel>], iteration_bounds = array<i64: 1>, scalar_prefetch = 0 : i64, scratch_operands = 0 : i64, tpu.core_type = #tpu.core_type<tc>, window_params = [{transform_indices = @transform_0, window_bounds = array<i64: 8, 32>}, {transform_indices = @transform_1, window_bounds = array<i64: 8, 1>}, {transform_indices = @transform_2, window_bounds = array<i64: 1, 8, 128>}]} {
    %c0 = arith.constant 0 : index
    %c0_0 = arith.constant 0 : index
    %0 = vector.load %arg1[%c0, %c0_0] : memref<8x32xf32, #tpu.memory_space<vmem>>, vector<8x32xf32>
    %c8_i32 = arith.constant 8 : i32
    %1 = arith.muli %arg0, %c8_i32 : i32
    %2 = tpu.iota {dimensions = array<i32: 0>} : vector<8x1xi32>
    %3 = vector.broadcast %1 : i32 to vector<8x1xi32>
    %4 = arith.addi %3, %2 : vector<8x1xi32>
    %c8_i32_1 = arith.constant 8 : i32
    %5 = vector.broadcast %c8_i32_1 : i32 to vector<8x1xi32>
    %6 = arith.cmpi slt, %4, %5 : vector<8x1xi32>
    %cst = arith.constant dense<0xFF800000> : vector<8xf32>
    %7 = vector.multi_reduction <maximumf>, %0, %cst [1] : vector<8x32xf32> to vector<8xf32>
    %8 = vector.shape_cast %7 : vector<8xf32> to vector<8x1xf32>
    %9 = vector.broadcast %8 : vector<8x1xf32> to vector<8x32xf32>
    %10 = arith.subf %0, %9 : vector<8x32xf32>
    %cst_2 = arith.constant dense<0.000000e+00> : vector<8xf32>
    %11 = vector.multi_reduction <add>, %10, %cst_2 [1] : vector<8x32xf32> to vector<8xf32>
    %12 = vector.shape_cast %11 : vector<8xf32> to vector<8x1xf32>
    %13 = math.exp %10 : vector<8x32xf32>
    %cst_3 = arith.constant dense<0.000000e+00> : vector<8xf32>
    %14 = vector.multi_reduction <add>, %13, %cst_3 [1] : vector<8x32xf32> to vector<8xf32>
    %15 = vector.shape_cast %14 : vector<8xf32> to vector<8x1xf32>
    %16 = math.log %15 : vector<8x1xf32>
    %c0_4 = arith.constant 0 : index
    %c0_5 = arith.constant 0 : index
    %17 = vector.load %arg2[%c0_4, %c0_5] : memref<8x1xi32, #tpu.memory_space<vmem>>, vector<8x1xi32>
    %18 = tpu.iota {dimensions = array<i32: 1>} : vector<8x32xi32>
    %19 = vector.broadcast %17 : vector<8x1xi32> to vector<8x32xi32>
    %20 = arith.cmpi eq, %18, %19 : vector<8x32xi32>
    %cst_6 = arith.constant 0.000000e+00 : f32
    %21 = vector.broadcast %cst_6 : f32 to vector<8x32xf32>
    %22 = arith.select %20, %10, %21 : vector<8x32xi1>, vector<8x32xf32>
    %cst_7 = arith.constant dense<0.000000e+00> : vector<8xf32>
    %23 = vector.multi_reduction <add>, %22, %cst_7 [1] : vector<8x32xf32> to vector<8xf32>
    %24 = vector.shape_cast %23 : vector<8xf32> to vector<8x1xf32>
    %cst_8 = arith.constant 3.200000e+01 : f32
    %25 = vector.broadcast %cst_8 : f32 to vector<8x1xf32>
    %26 = arith.mulf %25, %16 : vector<8x1xf32>
    %27 = arith.subf %26, %12 : vector<8x1xf32>
    %cst_9 = arith.constant 0.000000e+00 : f32
    %28 = vector.broadcast %cst_9 : f32 to vector<8x1xf32>
    %29 = arith.select %6, %27, %28 : vector<8x1xi1>, vector<8x1xf32>
    %c-100_i32 = arith.constant -100 : i32
    %30 = vector.broadcast %c-100_i32 : i32 to vector<8x1xi32>
    %31 = arith.cmpi ne, %17, %30 : vector<8x1xi32>
    %32 = arith.andi %6, %31 : vector<8x1xi1>
    %33 = arith.subf %16, %24 : vector<8x1xf32>
    %cst_10 = arith.constant 0.000000e+00 : f32
    %34 = vector.broadcast %cst_10 : f32 to vector<8x1xf32>
    %35 = arith.select %32, %33, %34 : vector<8x1xi1>, vector<8x1xf32>
    %36 = vector.shape_cast %29 : vector<8x1xf32> to vector<1x8x1xf32>
    %cst_11 = arith.constant dense<0.000000e+00> : vector<1xf32>
    %37 = vector.multi_reduction <add>, %36, %cst_11 [1, 2] : vector<1x8x1xf32> to vector<1xf32>
    %38 = vector.shape_cast %37 : vector<1xf32> to vector<1x1x1xf32>
    %39 = vector.extract %38[0, 0, 0] : f32 from vector<1x1x1xf32>
    %40 = vector.shape_cast %35 : vector<8x1xf32> to vector<1x8x1xf32>
    %cst_12 = arith.constant dense<0.000000e+00> : vector<1xf32>
    %41 = vector.multi_reduction <add>, %40, %cst_12 [1, 2] : vector<1x8x1xf32> to vector<1xf32>
    %42 = vector.shape_cast %41 : vector<1xf32> to vector<1x1x1xf32>
    %43 = vector.extract %42[0, 0, 0] : f32 from vector<1x1x1xf32>
    %44 = arith.extui %32 : vector<8x1xi1> to vector<8x1xi32>
    %45 = arith.sitofp %44 : vector<8x1xi32> to vector<8x1xf32>
    %46 = vector.shape_cast %45 : vector<8x1xf32> to vector<1x8x1xf32>
    %cst_13 = arith.constant dense<0.000000e+00> : vector<1xf32>
    %47 = vector.multi_reduction <add>, %46, %cst_13 [1, 2] : vector<1x8x1xf32> to vector<1xf32>
    %48 = vector.shape_cast %47 : vector<1xf32> to vector<1x1x1xf32>
    %49 = vector.extract %48[0, 0, 0] : f32 from vector<1x1x1xf32>
    %50 = tpu.iota {dimensions = array<i32: 1>} : vector<1x8x128xi32>
    %c0_i32 = arith.constant 0 : i32
    %51 = vector.broadcast %c0_i32 : i32 to vector<1x8x128xi32>
    %52 = arith.cmpi eq, %50, %51 : vector<1x8x128xi32>
    %cst_14 = arith.constant 0.000000e+00 : f32
    %53 = vector.broadcast %39 : f32 to vector<1x8x128xf32>
    %54 = vector.broadcast %cst_14 : f32 to vector<1x8x128xf32>
    %55 = arith.select %52, %53, %54 : vector<1x8x128xi1>, vector<1x8x128xf32>
    %c1_i32 = arith.constant 1 : i32
    %56 = vector.broadcast %c1_i32 : i32 to vector<1x8x128xi32>
    %57 = arith.cmpi eq, %50, %56 : vector<1x8x128xi32>
    %cst_15 = arith.constant 0.000000e+00 : f32
    %58 = vector.broadcast %43 : f32 to vector<1x8x128xf32>
    %59 = vector.broadcast %cst_15 : f32 to vector<1x8x128xf32>
    %60 = arith.select %57, %58, %59 : vector<1x8x128xi1>, vector<1x8x128xf32>
    %61 = arith.addf %55, %60 : vector<1x8x128xf32>
    %c2_i32 = arith.constant 2 : i32
    %62 = vector.broadcast %c2_i32 : i32 to vector<1x8x128xi32>
    %63 = arith.cmpi eq, %50, %62 : vector<1x8x128xi32>
    %cst_16 = arith.constant 0.000000e+00 : f32
    %64 = vector.broadcast %49 : f32 to vector<1x8x128xf32>
    %65 = vector.broadcast %cst_16 : f32 to vector<1x8x128xf32>
    %66 = arith.select %63, %64, %65 : vector<1x8x128xi1>, vector<1x8x128xf32>
    %67 = arith.addf %61, %66 : vector<1x8x128xf32>
    %c0_17 = arith.constant 0 : index
    %c0_18 = arith.constant 0 : index
    %c0_19 = arith.constant 0 : index
    %68 = vector.load %arg3[%c0_17, %c0_18, %c0_19] : memref<1x8x128xf32, #tpu.memory_space<vmem>>, vector<1x8x128xf32>
    tpu.vector_store %arg3[%c0_17, %c0_18, %c0_19], %67 {strides = array<i32>} : memref<1x8x128xf32, #tpu.memory_space<vmem>>, vector<1x8x128xf32>,
    return
  }
  func.func @transform_0(%arg0: i32) -> (i32, i32) {
    %c0_i32 = arith.constant 0 : i32
    %c0_i32_0 = arith.constant 0 : i32
    return %arg0, %c0_i32 : i32, i32
  }
  func.func @transform_1(%arg0: i32) -> (i32, i32) {
    %c0_i32 = arith.constant 0 : i32
    %c0_i32_0 = arith.constant 0 : i32
    return %arg0, %c0_i32 : i32, i32
  }
  func.func @transform_2(%arg0: i32) -> (i32, i32, i32) {
    %c0_i32 = arith.constant 0 : i32
    %c0_i32_0 = arith.constant 0 : i32
    %c0_i32_1 = arith.constant 0 : i32
    return %arg0, %c0_i32, %c0_i32_0 : i32, i32, i32
  }
}

</mosaic_0001>

<bundles_post_ra>
// kernel: tpu_custom_call.1
= control target key start
LH: loop header
LB: loop body
LE: loop exit
PB: predicated region body
PF: predicated region fallthrough
CT: control target
= control target key end

     0   :  { %vm19_vm0 = vcmask 261120   ;;  %s185_s0 = inlined_call_operand.vmem [shape: f32[8,32], index: 0, kind: input, shape index: {}]   ;;  %s186_s1 = inlined_call_operand.vmem [shape: s32[8,1], index: 1, kind: input, shape index: {}]   ;;  %s187_s2 = inlined_call_operand.hbm [shape: f32[1,8,128], index: 2, kind: output, shape index: {}]  }
   0x1   :  { %v12_v0 = vld [vmem:[%s185_s0] sm:$0xff] }
   0x2   :  { %7 = vsyncpa [#allocation3], 0  ;;  %v20_v1 = vsel %vm19_vm0, %v12_v0, -inf  ;;  %v154_v2 = vmov 0   ;;  %v34_v3 = vld [vmem:[%s186_s1] sm:$0xff]  ;;  %v14_v10 = vlaneseq  ;;  %vm52_vm3 = vcmask 7168  }
   0x3   :  { %123 = vset.pattern.permute.xlu0 %v154_v2  ;;  %vm48_vm2 = vcmp.ne.s32.totalorder %v34_v3, 4294967196  ;;  %v155_v26 = vmov 0.0   ;;  %s156_s13 = smov [#allocation2]   ;;  %s104_s18 = sshll.u32 %s187_s2, 4  ;;  %s105_s18 = int_to_ptr.hbm [resolvable:$true] %s104_s18 }
   0x4   :  { %21 = vmax.xlane.f32.xlu0 %v20_v1  ;;  %v36_v11 = vand.u32 127, %v14_v10  ;;  %v113_v27 = vsel %vm48_vm2, 1.0, %v155_v26  ;;  %v15_v50 = vshrl.u32 %v14_v10, 7  ;;  %s102_s14 = sshll.u32 %s156_s13, 4  ;;  %s103_s14 = int_to_ptr.vmem [resolvable:$true] %s102_s14 }
   0x5   :  { %v75_v28 = vsel %vm52_vm3, %v113_v27, 0.0 }
   0x6   :  { %vm85_vm4 = vcmp.eq.s32.totalorder %v15_v50, 0  ;;  %vm88_vm5 = vcmp.eq.s32.totalorder %v15_v50, 1  ;;  %vm92_vm6 = vcmp.eq.s32.totalorder %v15_v50, 2 }
  0x18   :  { %38 = vperm.xlu0 %123, %v34_v3  }
  0x77   :  { %v22_v4 = vpop.xlane.xlu0 %21 }
  0x78   :  { %v23_v5 = vsub.f32 %v12_v0, %v22_v4 }
  0x7a   :  { %v27_v6 = vmul.f32 1.442695, %v23_v5  ;;  %v24_v7 = vsel %vm19_vm0, %v23_v5, 0.0 }
  0x7b   :  { %25 = vadd.xlane.f32.xlu2 %v24_v7 }
  0x7c   :  { %124 = vpow2.f32 %v27_v6 }
  0x82   :  { %v125_v8 = vpop.eup %124 }
  0x83   :  { %v29_v9 = vsel %vm19_vm0, %v125_v8, 0.0 }
  0x84   :  { %30 = vadd.xlane.f32.xlu1 %v29_v9 }
  0x8a   :  { %v39_v12 = vpop.permute.xlu0 %38 }
  0x8b   :  { %vm40_vm1 = vcmp.eq.s32.totalorder %v36_v11, %v39_v12 }
  0x8c   :  { %v41_v13 = vsel %vm40_vm1, %v23_v5, 0.0 }
  0x8d   :  { %v42_v14 = vsel %vm19_vm0, %v41_v13, 0.0 }
  0x8e   :  { %43 = vadd.xlane.f32.xlu1 %v42_v14 }
  0xee   :  { %v26_v20 = vpop.xlane.xlu2 %25 }
  0xf7   :  { %v31_v15 = vpop.xlane.xlu1 %30 }
  0xf8   :  { %126 = vlog2.f32 %v31_v15 }
  0xfe   :  { %v127_v16 = vpop.eup %126 }
  0xff   :  { %v33_v17 = vmul.f32 0.6931472, %v127_v16 }
 0x101   :  { %v45_v18 = vmul.f32 32.0, %v33_v17  ;;  %v44_v19 = vpop.xlane.xlu1 %43 }
 0x102   :  { %v50_v21 = vsub.f32 %v33_v17, %v44_v19 }
 0x103   :  { %v46_v22 = vsub.f32 %v45_v18, %v26_v20 }
 0x104   :  { %v51_v23 = vsel %vm48_vm2, %v50_v21, 0.0 }
 0x105   :  { %v53_v24 = vsel %vm52_vm3, %v46_v22, 0.0  ;;  %v63_v25 = vsel %vm52_vm3, %v51_v23, 0.0 }
 0x106   :  { %54 = vadd.xlane.f32.xlu2 %v53_v24  ;;  %64 = vadd.xlane.f32.xlu1 %v63_v25 }
 0x10e   :  { %76 = vadd.xlane.f32.xlu2 %v75_v28 }
 0x179   :  { %v55_v29 = vpop.xlane.xlu2 %54  ;;  %v65_v30 = vpop.xlane.xlu1 %64 }
 0x17a   :  { %v56_v31 = vrot.slane %v55_v29, 4  ;;  %v66_v32 = vrot.slane %v65_v30, 4 }
 0x17c   :  { %v57_v33 = vadd.f32 %v56_v31, %v55_v29  ;;  %v67_v34 = vadd.f32 %v66_v32, %v65_v30 }
 0x17e   :  { %v58_v35 = vrot.slane %v57_v33, 2  ;;  %v68_v36 = vrot.slane %v67_v34, 2 }
 0x180   :  { %v69_v37 = vadd.f32 %v68_v36, %v67_v34  ;;  %v59_v38 = vadd.f32 %v58_v35, %v57_v33 }
 0x181   :  { %v77_v39 = vpop.xlane.xlu2 %76 }
 0x182   :  { %v78_v40 = vrot.slane %v77_v39, 4  ;;  %v60_v41 = vrot.slane %v59_v38, 1  ;;  %v70_v42 = vrot.slane %v69_v37, 1 }
 0x184   :  { %v79_v43 = vadd.f32 %v78_v40, %v77_v39  ;;  %v61_v44 = vadd.f32 %v60_v41, %v59_v38  ;;  %v71_v45 = vadd.f32 %v70_v42, %v69_v37 }
 0x186   :  { %v80_v46 = vrot.slane %v79_v43, 2  ;;  %114 = vpush %v61_v44 }
 0x187   :  { %116 = vpush %v71_v45 }
 0x188   :  { %v81_v47 = vadd.f32 %v80_v46, %v79_v43 }
 0x18a   :  { %v82_v48 = vrot.slane %v81_v47, 1 }
 0x18c   :  { %v83_v49 = vadd.f32 %v82_v48, %v81_v47 }
 0x18e   :  { %118 = vpush %v83_v49 }
 0x1b7   :  { %s115_s0 = spop %114 }
 0x1b8   :  { %s117_s1 = spop %116  ;;  %v86_v51 = vstv %s115_s0 }
 0x1b9   :  { %v89_v52 = vstv %s117_s1  ;;  %v87_v53 = vsel %vm85_vm4, %v86_v51, 0.0 }
 0x1ba   :  { %v90_v54 = vsel %vm88_vm5, %v89_v52, 0.0 }
 0x1bb   :  { %v91_v55 = vadd.f32 %v90_v54, %v87_v53 }
 0x1bf   :  { %s119_s15 = spop %118 }
 0x1c0   :  { %v93_v56 = vstv %s119_s15 }
 0x1c1   :  { %v94_v57 = vsel %vm92_vm6, %v93_v56, 0.0 }
 0x1c2   :  { %v95_v58 = vadd.f32 %v94_v57, %v91_v55 }
 0x1c4   :  { %96 = vst [vmem:[#allocation2] sm:$0xff] %v95_v58 }
 0x1c5   :  { %107 = dma.vmem_to_hbm [thread:$0]  %s103_s14, 128, %s105_s18, [#allocation3]  }
 0x1c6   :  { %152 = dma.done.wait [#allocation3], 128  }
 0x1c7   :  { %153 = vsyncadd [#allocation3], 4294967168 }
 0x1c8   :  { %112 = vsyncpa [#allocation3], 1 }

</bundles_post_ra>
